<compile_context>
chip_gen: v6e
topology: v6e:2x2x1
jax: 0.10.0
libtpu: 0.0.40
codegen_flags: <defaults>
</compile_context>

<pallas_src>
import functools
import math

import jax
import jax.numpy as jnp
from jax.experimental import pallas as pl
from jax.experimental.pallas import tpu as pltpu


# ----------------------------------------------------------------------------
# Hardware-aware helpers
# ----------------------------------------------------------------------------
_VMEM_CAP = None
_ROLL_OK = None


def _tpu_vmem_capacity():
    global _VMEM_CAP
    if _VMEM_CAP is None:
        try:
            _VMEM_CAP = int(pltpu.get_tpu_info().vmem_capacity_bytes)
        except Exception:
            _VMEM_CAP = 128 * 1024 * 1024
    return _VMEM_CAP


def _vmem_limit_bytes():
    # ~48 MiB on v7x (64 MiB physical per TC), 96 MiB on v5e/v6e (128 MiB).
    return min(_tpu_vmem_capacity() * 3 // 4, 96 * 1024 * 1024)


def _roll_supported():
    """Probe pltpu.roll (sublane axis of a 3D slab) once; fall back if needed."""
    global _ROLL_OK
    if _ROLL_OK is None:
        def probe(x_ref, o_ref):
            o_ref[...] = pltpu.roll(x_ref[...], 1, 1)

        x = jnp.arange(8 * 16 * 8, dtype=jnp.float32).reshape(8, 16, 8)
        try:
            y = pl.pallas_call(
                probe, out_shape=jax.ShapeDtypeStruct(x.shape, x.dtype))(x)
            _ROLL_OK = bool(jnp.array_equal(y, jnp.roll(x, 1, axis=1)))
        except Exception:
            _ROLL_OK = False
    return _ROLL_OK


def _pick_row_block(h_out, w_out, c_in, c_out, upsample):
    """Largest divisor of h_out (even when upsampling) within a VMEM budget."""
    bytes_per_row = w_out * (2 * c_in + 4 * c_out + 2 * c_out) + 1
    budget = max(1, _tpu_vmem_capacity() // 16)   # ~8 MiB (v5e/v6e), ~4 MiB (v7x)
    cap = max(8, min(64, budget // bytes_per_row))
    best = 2 if upsample else 1
    for bh in range(1, h_out + 1):
        if h_out % bh:
            continue
        if upsample and bh % 2:
            continue
        if bh <= cap and bh > best:
            best = bh
    return min(best, h_out)


# ----------------------------------------------------------------------------
# Pallas kernel: fused 3x3 conv (+bias, +LeakyReLU, +residual, +2x upsample)
# ----------------------------------------------------------------------------
def _shift_cols(slab, direction, col, use_roll):
    """Shift slab along W with zero fill.  direction=+1: out[:, w] = slab[:, w-1]."""
    w_out = slab.shape[1]
    if use_roll:
        shifted = pltpu.roll(slab, 1 if direction > 0 else w_out - 1, 1)
        edge = 0 if direction > 0 else w_out - 1
        return jnp.where(col == edge, 0.0, shifted)
    # Fallback path (only if the roll probe failed): explicit zero column.
    zero_col = jnp.zeros_like(slab[:, :1, :])
    if direction > 0:
        return jnp.concatenate([zero_col, slab[:, :w_out - 1, :]], axis=1)
    return jnp.concatenate([slab[:, 1:, :], zero_col], axis=1)


def _conv3x3_kernel(xw_ref, w_ref, b_ref, *rest, blk_h, w_out, c_in, c_out,
                    upsample, in_lrelu, out_lrelu, out_scale, has_res,
                    use_roll):
    # xw_ref : (1, 1, bh_in+2, w_out, c_in)  bf16 row window (halo rows zeroed,
    #          width already 2x-upsampled when `upsample`)
    # w_ref  : (3, 3*c_in, c_out)            bf16 weights, dy major, K = dx*c_in+cin
    # b_ref  : (1, c_out)                    f32 bias
    # res_ref: (1, blk_h, w_out, c_out)      bf16 residual (optional)
    # o_ref  : (1, blk_h, w_out, c_out)
    # acc_ref: (blk_h*w_out, c_out)          f32 VMEM scratch accumulator
    if has_res:
        res_ref, o_ref, acc_ref = rest
    else:
        o_ref, acc_ref = rest
        res_ref = None

    # Elementwise work stays in f32 (v5e VPU has no bf16 path); values are
    # bf16-exact so the final cast back to bf16 before the MXU is lossless.
    win = xw_ref[0, 0].astype(jnp.float32)
    if in_lrelu:
        win = jnp.where(win >= 0.0, win, 0.2 * win)
    if upsample:
        # Nearest 2x along rows (leading dim -> cheap), keep blk_h+2 halo rows.
        win = jnp.repeat(win, 2, axis=0)[1:blk_h + 3]

    col = jax.lax.broadcasted_iota(jnp.int32, (blk_h, w_out, 1), 1)
    m = blk_h * w_out

    for dy in range(3):
        slab = win[dy:dy + blk_h]                      # (blk_h, w_out, c_in)
        left = _shift_cols(slab, +1, col, use_roll)    # input col w-1
        right = _shift_cols(slab, -1, col, use_roll)   # input col w+1
        patch = jnp.concatenate([left, slab, right], axis=-1)   # K = 3*c_in
        patch = patch.reshape(m, 3 * c_in).astype(jnp.bfloat16)
        part = jnp.dot(patch, w_ref[dy], preferred_element_type=jnp.float32)
        if dy == 0:
            acc_ref[...] = part
        else:
            acc_ref[...] += part

    acc = acc_ref[...] + b_ref[0, :]
    if out_lrelu:
        acc = jnp.where(acc >= 0.0, acc, 0.2 * acc)
    if out_scale != 1.0:
        acc = acc * out_scale
    if has_res:
        acc = acc + res_ref[0].astype(jnp.float32).reshape(m, c_out)
    o_ref[0] = acc.reshape(blk_h, w_out, c_out).astype(o_ref.dtype)


def _gather_row_windows(x, bh_in, num_blocks):
    """(N, H, W, C) -> (N, R, bh_in+2, W, C) row windows with zeroed halo rows.

    Replaces jnp.pad + overlapping reads: each Pallas grid step streams exactly
    one disjoint window block along the new R axis.
    """
    h = x.shape[1]
    rows = (jnp.arange(num_blocks) * bh_in)[:, None] + (jnp.arange(bh_in + 2) - 1)[None, :]
    valid = (rows >= 0) & (rows < h)
    xw = x[:, jnp.clip(rows, 0, h - 1)]
    return xw * valid[None, :, :, None, None].astype(x.dtype)


def conv3x3(x, w, b, *, lrelu=False, in_lrelu=False, upsample=False,
            out_scale=1.0, residual=None, out_dtype=jnp.bfloat16):
    """Fused 3x3 conv, stride 1, pad 1, NHWC, bf16 MXU operands / f32 accum.

    out = conv3x3(lrelu_in?(upsample2x?(x))) + bias
    out = leaky_relu(out)  (if lrelu)
    out = out * out_scale + residual (if residual is not None)
    """
    n, h, wid, c_in = x.shape
    c_out = w.shape[-1]
    h_out = 2 * h if upsample else h
    w_out = 2 * wid if upsample else wid

    blk_h = _pick_row_block(h_out, w_out, c_in, c_out, upsample)
    r_blocks = h_out // blk_h
    bh_in = blk_h // 2 if upsample else blk_h

    xw = _gather_row_windows(x.astype(jnp.bfloat16), bh_in, r_blocks)
    if upsample:
        xw = jnp.repeat(xw, 2, axis=3)          # nearest 2x along W (prep side)
    w3 = w.reshape(3, 3 * c_in, c_out).astype(jnp.bfloat16)
    b2 = b.reshape(1, c_out).astype(jnp.float32)

    has_res = residual is not None
    kernel = functools.partial(
        _conv3x3_kernel, blk_h=blk_h, w_out=w_out, c_in=c_in, c_out=c_out,
        upsample=upsample, in_lrelu=in_lrelu, out_lrelu=lrelu,
        out_scale=out_scale, has_res=has_res, use_roll=_roll_supported())

    in_specs = [
        pl.BlockSpec((1, 1, bh_in + 2, w_out, c_in),
                     lambda bi, ri: (bi, ri, 0, 0, 0)),
        pl.BlockSpec((3, 3 * c_in, c_out), lambda bi, ri: (0, 0, 0)),
        pl.BlockSpec((1, c_out), lambda bi, ri: (0, 0)),
    ]
    args = [xw, w3, b2]
    if has_res:
        in_specs.append(
            pl.BlockSpec((1, blk_h, w_out, c_out), lambda bi, ri: (bi, ri, 0, 0)))
        args.append(residual.astype(jnp.bfloat16))

    return pl.pallas_call(
        kernel,
        out_shape=jax.ShapeDtypeStruct((n, h_out, w_out, c_out), out_dtype),
        grid=(n, r_blocks),
        in_specs=in_specs,
        out_specs=pl.BlockSpec((1, blk_h, w_out, c_out),
                               lambda bi, ri: (bi, ri, 0, 0)),
        scratch_shapes=[pltpu.VMEM((blk_h * w_out, c_out), jnp.float32)],
        compiler_params=pltpu.CompilerParams(
            dimension_semantics=("parallel", "parallel"),
            vmem_limit_bytes=_vmem_limit_bytes(),
        ),
    )(*args)


# ----------------------------------------------------------------------------
# Parameter init (deterministic, synthetic)
# ----------------------------------------------------------------------------
def init_conv(key, cin, cout):
    k1, k2 = jax.random.split(key)
    fan_in = cin * 9
    w = jax.random.normal(k1, (3, 3, cin, cout), jnp.float32) / math.sqrt(fan_in)
    b = jax.random.normal(k2, (cout,), jnp.float32) * 0.01
    return w, b


def init_rdb(key, ch, gc):
    ks = jax.random.split(key, 5)
    return {
        "c1": init_conv(ks[0], ch, gc),
        "c2": init_conv(ks[1], ch + gc, gc),
        "c3": init_conv(ks[2], ch + 2 * gc, gc),
        "c4": init_conv(ks[3], ch + 3 * gc, gc),
        "c5": init_conv(ks[4], ch + 4 * gc, ch),
    }


def init_rrdb(key, ch, gc):
    ks = jax.random.split(key, 3)
    return {
        "rdb1": init_rdb(ks[0], ch, gc),
        "rdb2": init_rdb(ks[1], ch, gc),
        "rdb3": init_rdb(ks[2], ch, gc),
    }


def init_net(key, in_ch, out_ch, ch, num_rrdb, gc):
    ks = iter(jax.random.split(key, 12 + 2 * num_rrdb))
    return {
        "initial": init_conv(next(ks), in_ch, ch),
        "rrdb1": [init_rrdb(next(ks), ch, gc) for _ in range(num_rrdb)],
        "trunk1": init_conv(next(ks), ch, ch),
        "up1": init_conv(next(ks), ch, ch),
        "up2": init_conv(next(ks), ch, ch),
        "end_up1": init_conv(next(ks), ch, ch),
        "rrdb2": [init_rrdb(next(ks), ch, gc) for _ in range(num_rrdb)],
        "trunk2": init_conv(next(ks), ch, ch),
        "up3": init_conv(next(ks), ch, ch),
        "up4": init_conv(next(ks), ch, ch),
        "end_up2": init_conv(next(ks), ch, ch),
        "end": init_conv(next(ks), ch, out_ch),
    }


# ----------------------------------------------------------------------------
# Forward pass (mirrors PT_RRDB_Net_16x.forward with skiplast=False)
# ----------------------------------------------------------------------------
def rdb_forward(p, x):
    # TODO(synk): fuse the channel-concats into the conv kernel as a sum of
    # per-part matmuls (variadic input refs) to drop the remaining concat
    # materialization; they are still formed by XLA before the window gather.
    x1 = conv3x3(x, *p["c1"], lrelu=True)
    x2 = conv3x3(jnp.concatenate([x, x1], -1), *p["c2"], lrelu=True)
    x3 = conv3x3(jnp.concatenate([x, x1, x2], -1), *p["c3"], lrelu=True)
    x4 = conv3x3(jnp.concatenate([x, x1, x2, x3], -1), *p["c4"], lrelu=True)
    # x5 * 0.2 + x fused into the conv epilogue.
    return conv3x3(jnp.concatenate([x, x1, x2, x3, x4], -1), *p["c5"],
                   out_scale=0.2, residual=x)


def rrdb_forward(p, x):
    out = rdb_forward(p["rdb1"], x)
    out = rdb_forward(p["rdb2"], out)
    out = rdb_forward(p["rdb3"], out)
    return (out.astype(jnp.float32) * 0.2 + x.astype(jnp.float32)).astype(
        jnp.bfloat16)


def net_forward(params, x_nchw):
    x = jnp.transpose(x_nchw, (0, 2, 3, 1)).astype(jnp.bfloat16)  # NCHW -> NHWC

    fr = conv3x3(x, *params["initial"])
    b1 = fr
    for p in params["rrdb1"]:
        b1 = rrdb_forward(p, b1)
    fr = conv3x3(b1, *params["trunk1"], residual=fr)      # fr + trunk1(b1)

    fr = conv3x3(fr, *params["up1"], lrelu=True, upsample=True)
    fr = conv3x3(fr, *params["up2"], lrelu=True, upsample=True)
    fr = conv3x3(fr, *params["end_up1"])

    b2 = fr
    for p in params["rrdb2"]:
        b2 = rrdb_forward(p, b2)
    fr = conv3x3(b2, *params["trunk2"], residual=fr)      # fr + trunk2(b2)

    fr = conv3x3(fr, *params["up3"], lrelu=True, upsample=True)
    fr = conv3x3(fr, *params["up4"], lrelu=True, upsample=True)
    fr = conv3x3(fr, *params["end_up2"])

    # end_conv2d(leaky_relu(fr)) : input-side LeakyReLU fused into the kernel.
    fr = conv3x3(fr, *params["end"], in_lrelu=True, out_dtype=jnp.float32)
    return jnp.transpose(fr, (0, 3, 1, 2))                # NHWC -> NCHW


# ----------------------------------------------------------------------------
# Reference conv (XLA) for an in-script correctness check of the fused kernel
# ----------------------------------------------------------------------------
def _ref_conv3x3(x, w, b, *, lrelu=False, in_lrelu=False, upsample=False,
                 out_scale=1.0, residual=None):
    xf = x.astype(jnp.float32)
    if in_lrelu:
        xf = jnp.where(xf >= 0.0, xf, 0.2 * xf)
    if upsample:
        xf = jnp.repeat(jnp.repeat(xf, 2, axis=1), 2, axis=2)
    xf = xf.astype(jnp.bfloat16).astype(jnp.float32)
    wf = w.astype(jnp.bfloat16).astype(jnp.float32)
    y = jax.lax.conv_general_dilated(
        xf, wf, window_strides=(1, 1), padding=((1, 1), (1, 1)),
        dimension_numbers=("NHWC", "HWIO", "NHWC"))
    y = y + b.astype(jnp.float32)
    if lrelu:
        y = jnp.where(y >= 0.0, y, 0.2 * y)
    y = y * out_scale
    if residual is not None:
        y = y + residual.astype(jnp.float32)
    return y


# ----------------------------------------------------------------------------
if __name__ == "__main__":
    key = jax.random.PRNGKey(0)
    kp, kx, k1, k2, k3, k4 = jax.random.split(key, 6)

    # --- sanity-check the fused conv kernel against the XLA reference --------
    xt = jax.random.normal(k1, (2, 8, 8, 40), jnp.float32).astype(jnp.bfloat16)
    wt, bt = init_conv(k2, 40, 8)
    rt = jax.random.normal(k3, (2, 8, 8, 8), jnp.float32).astype(jnp.bfloat16)
    got = conv3x3(xt, wt, bt, out_scale=0.2, residual=rt).astype(jnp.float32)
    want = _ref_conv3x3(xt, wt, bt, out_scale=0.2, residual=rt)
    assert jnp.allclose(got, want, atol=5e-2, rtol=5e-2), float(
        jnp.max(jnp.abs(got - want)))

    xt2 = jax.random.normal(k4, (2, 8, 8, 8), jnp.float32).astype(jnp.bfloat16)
    wt2, bt2 = init_conv(k3, 8, 8)
    got2 = conv3x3(xt2, wt2, bt2, lrelu=True, upsample=True).astype(jnp.float32)
    want2 = _ref_conv3x3(xt2, wt2, bt2, lrelu=True, upsample=True)
    assert jnp.allclose(got2, want2, atol=5e-2, rtol=5e-2), float(
        jnp.max(jnp.abs(got2 - want2)))

    # --- full PT_RRDB_Net_16x forward ----------------------------------------
    in_channels, out_channels, channels, num_rrdb, growth_channels = 4, 4, 8, 1, 8
    batch, height, width = 2, 8, 8

    params = init_net(kp, in_channels, out_channels, channels, num_rrdb,
                      growth_channels)
    x = jax.random.normal(kx, (batch, in_channels, height, width), jnp.float32)

    fwd = jax.jit(net_forward)
    y = fwd(params, x)
    jax.block_until_ready(y)

    assert y.shape == (batch, out_channels, 16 * height, 16 * width), y.shape
    assert y.dtype == jnp.float32
    print("KERNEL_OK")
</pallas_src>

<mosaic_0001>
module attributes {stable_mosaic.version = 11 : i64} {
  func.func @probe(%arg0: memref<8x16x8xf32, #tpu.memory_space<vmem>>, %arg1: memref<8x16x8xf32, #tpu.memory_space<vmem>>) attributes {dimension_semantics = [], scalar_prefetch = 0 : i64, scratch_operands = 0 : i64, tpu.core_type = #tpu.core_type<tc>} {
    %c0 = arith.constant 0 : index
    %c0_0 = arith.constant 0 : index
    %c0_1 = arith.constant 0 : index
    %0 = vector.load %arg0[%c0, %c0_0, %c0_1] : memref<8x16x8xf32, #tpu.memory_space<vmem>>, vector<8x16x8xf32>
    %c1_i32 = arith.constant 1 : i32
    %1 = tpu.dynamic_rotate %0 by %c1_i32 dim 1 : vector<8x16x8xf32>, i32 -> vector<8x16x8xf32>
    %c0_2 = arith.constant 0 : index
    %c0_3 = arith.constant 0 : index
    %c0_4 = arith.constant 0 : index
    %2 = vector.load %arg1[%c0_2, %c0_3, %c0_4] : memref<8x16x8xf32, #tpu.memory_space<vmem>>, vector<8x16x8xf32>
    tpu.vector_store %arg1[%c0_2, %c0_3, %c0_4], %1 {strides = array<i32>} : memref<8x16x8xf32, #tpu.memory_space<vmem>>, vector<8x16x8xf32>,
    return
  }
}

module attributes {stable_mosaic.version = 11 : i64} {
  func.func @_conv3x3_kernel(%arg0: i32, %arg1: i32, %arg2: memref<1x1x10x8x40xbf16, #tpu.memory_space<vmem>>, %arg3: memref<3x120x8xbf16, #tpu.memory_space<vmem>>, %arg4: memref<1x8xf32, #tpu.memory_space<vmem>>, %arg5: memref<1x8x8x8xbf16, #tpu.memory_space<vmem>>, %arg6: memref<1x8x8x8xbf16, #tpu.memory_space<vmem>>, %arg7: memref<64x8xf32, #tpu.memory_space<vmem>>) attributes {dimension_semantics = [#tpu.dimension_semantics<parallel>, #tpu.dimension_semantics<parallel>], iteration_bounds = array<i64: 2, 1>, scalar_prefetch = 0 : i64, scratch_operands = 1 : i64, tpu.core_type = #tpu.core_type<tc>, window_params = [{transform_indices = @transform_0, window_bounds = array<i64: 1, 1, 10, 8, 40>}, {pipeline_mode = #tpu.pipeline_mode<synchronous>, transform_indices = @transform_1, window_bounds = array<i64: 3, 120, 8>}, {pipeline_mode = #tpu.pipeline_mode<synchronous>, transform_indices = @transform_2, window_bounds = array<i64: 1, 8>}, {transform_indices = @transform_3, window_bounds = array<i64: 1, 8, 8, 8>}, {transform_indices = @transform_4, window_bounds = array<i64: 1, 8, 8, 8>}]} {
    %c0 = arith.constant 0 : index
    %c0_0 = arith.constant 0 : index
    %c0_1 = arith.constant 0 : index
    %c0_2 = arith.constant 0 : index
    %c0_3 = arith.constant 0 : index
    %0 = vector.load %arg2[%c0, %c0_0, %c0_1, %c0_2, %c0_3] : memref<1x1x10x8x40xbf16, #tpu.memory_space<vmem>>, vector<1x1x10x8x40xbf16>
    %1 = vector.shape_cast %0 : vector<1x1x10x8x40xbf16> to vector<10x8x40xbf16>
    %2 = arith.extf %1 : vector<10x8x40xbf16> to vector<10x8x40xf32>
    %3 = vector.extract_strided_slice %2 {offsets = [0, 0, 0], sizes = [8, 8, 40], strides = [1, 1, 1]} : vector<10x8x40xf32> to vector<8x8x40xf32>
    %cst = arith.constant 0.000000e+00 : f32
    %4 = vector.broadcast %cst : f32 to vector<8x1x40xf32>
    %5 = vector.extract_strided_slice %3 {offsets = [0, 0, 0], sizes = [8, 7, 40], strides = [1, 1, 1]} : vector<8x8x40xf32> to vector<8x7x40xf32>
    %6 = tpu.concatenate %4, %5 in 1 : vector<8x1x40xf32>, vector<8x7x40xf32> -> vector<8x8x40xf32>
    %cst_4 = arith.constant 0.000000e+00 : f32
    %7 = vector.broadcast %cst_4 : f32 to vector<8x1x40xf32>
    %8 = vector.extract_strided_slice %3 {offsets = [0, 1, 0], sizes = [8, 7, 40], strides = [1, 1, 1]} : vector<8x8x40xf32> to vector<8x7x40xf32>
    %9 = tpu.concatenate %8, %7 in 1 : vector<8x7x40xf32>, vector<8x1x40xf32> -> vector<8x8x40xf32>
    %10 = tpu.concatenate %6, %3, %9 in 2 : vector<8x8x40xf32>, vector<8x8x40xf32>, vector<8x8x40xf32> -> vector<8x8x120xf32>
    %11 = vector.shape_cast %10 : vector<8x8x120xf32> to vector<64x120xf32>
    %12 = arith.truncf %11 : vector<64x120xf32> to vector<64x120xbf16>
    %c0_5 = arith.constant 0 : index
    %c0_6 = arith.constant 0 : index
    %c0_7 = arith.constant 0 : index
    %13 = vector.load %arg3[%c0_5, %c0_6, %c0_7] : memref<3x120x8xbf16, #tpu.memory_space<vmem>>, vector<1x120x8xbf16>
    %14 = vector.shape_cast %13 : vector<1x120x8xbf16> to vector<120x8xbf16>
    %cst_8 = arith.constant dense<0.000000e+00> : vector<64x8xf32>
    %15 = tpu.matmul %12, %14, %cst_8 {dimension_numbers = #tpu.dot_dimension_numbers<[1], [0], [0], [1], [0, 0, 1, 1], [], []>} : vector<64x120xbf16>, vector<120x8xbf16>, vector<64x8xf32> -> vector<64x8xf32>
    %c0_9 = arith.constant 0 : index
    %c0_10 = arith.constant 0 : index
    %16 = vector.load %arg7[%c0_9, %c0_10] : memref<64x8xf32, #tpu.memory_space<vmem>>, vector<64x8xf32>
    tpu.vector_store %arg7[%c0_9, %c0_10], %15 {strides = array<i32>} : memref<64x8xf32, #tpu.memory_space<vmem>>, vector<64x8xf32>,
    %17 = vector.extract_strided_slice %2 {offsets = [1, 0, 0], sizes = [8, 8, 40], strides = [1, 1, 1]} : vector<10x8x40xf32> to vector<8x8x40xf32>
    %cst_11 = arith.constant 0.000000e+00 : f32
    %18 = vector.broadcast %cst_11 : f32 to vector<8x1x40xf32>
    %19 = vector.extract_strided_slice %17 {offsets = [0, 0, 0], sizes = [8, 7, 40], strides = [1, 1, 1]} : vector<8x8x40xf32> to vector<8x7x40xf32>
    %20 = tpu.concatenate %18, %19 in 1 : vector<8x1x40xf32>, vector<8x7x40xf32> -> vector<8x8x40xf32>
    %cst_12 = arith.constant 0.000000e+00 : f32
    %21 = vector.broadcast %cst_12 : f32 to vector<8x1x40xf32>
    %22 = vector.extract_strided_slice %17 {offsets = [0, 1, 0], sizes = [8, 7, 40], strides = [1, 1, 1]} : vector<8x8x40xf32> to vector<8x7x40xf32>
    %23 = tpu.concatenate %22, %21 in 1 : vector<8x7x40xf32>, vector<8x1x40xf32> -> vector<8x8x40xf32>
    %24 = tpu.concatenate %20, %17, %23 in 2 : vector<8x8x40xf32>, vector<8x8x40xf32>, vector<8x8x40xf32> -> vector<8x8x120xf32>
    %25 = vector.shape_cast %24 : vector<8x8x120xf32> to vector<64x120xf32>
    %26 = arith.truncf %25 : vector<64x120xf32> to vector<64x120xbf16>
    %c1 = arith.constant 1 : index
    %c0_13 = arith.constant 0 : index
    %c0_14 = arith.constant 0 : index
    %27 = vector.load %arg3[%c1, %c0_13, %c0_14] : memref<3x120x8xbf16, #tpu.memory_space<vmem>>, vector<1x120x8xbf16>
    %28 = vector.shape_cast %27 : vector<1x120x8xbf16> to vector<120x8xbf16>
    %cst_15 = arith.constant dense<0.000000e+00> : vector<64x8xf32>
    %29 = tpu.matmul %26, %28, %cst_15 {dimension_numbers = #tpu.dot_dimension_numbers<[1], [0], [0], [1], [0, 0, 1, 1], [], []>} : vector<64x120xbf16>, vector<120x8xbf16>, vector<64x8xf32> -> vector<64x8xf32>
    %c0_16 = arith.constant 0 : index
    %c0_17 = arith.constant 0 : index
    %30 = vector.load %arg7[%c0_16, %c0_17] : memref<64x8xf32, #tpu.memory_space<vmem>>, vector<64x8xf32>
    %31 = arith.addf %30, %29 : vector<64x8xf32>
    %c0_18 = arith.constant 0 : index
    %c0_19 = arith.constant 0 : index
    %32 = vector.load %arg7[%c0_18, %c0_19] : memref<64x8xf32, #tpu.memory_space<vmem>>, vector<64x8xf32>
    tpu.vector_store %arg7[%c0_18, %c0_19], %31 {strides = array<i32>} : memref<64x8xf32, #tpu.memory_space<vmem>>, vector<64x8xf32>,
    %33 = vector.extract_strided_slice %2 {offsets = [2, 0, 0], sizes = [8, 8, 40], strides = [1, 1, 1]} : vector<10x8x40xf32> to vector<8x8x40xf32>
    %cst_20 = arith.constant 0.000000e+00 : f32
    %34 = vector.broadcast %cst_20 : f32 to vector<8x1x40xf32>
    %35 = vector.extract_strided_slice %33 {offsets = [0, 0, 0], sizes = [8, 7, 40], strides = [1, 1, 1]} : vector<8x8x40xf32> to vector<8x7x40xf32>
    %36 = tpu.concatenate %34, %35 in 1 : vector<8x1x40xf32>, vector<8x7x40xf32> -> vector<8x8x40xf32>
    %cst_21 = arith.constant 0.000000e+00 : f32
    %37 = vector.broadcast %cst_21 : f32 to vector<8x1x40xf32>
    %38 = vector.extract_strided_slice %33 {offsets = [0, 1, 0], sizes = [8, 7, 40], strides = [1, 1, 1]} : vector<8x8x40xf32> to vector<8x7x40xf32>
    %39 = tpu.concatenate %38, %37 in 1 : vector<8x7x40xf32>, vector<8x1x40xf32> -> vector<8x8x40xf32>
    %40 = tpu.concatenate %36, %33, %39 in 2 : vector<8x8x40xf32>, vector<8x8x40xf32>, vector<8x8x40xf32> -> vector<8x8x120xf32>
    %41 = vector.shape_cast %40 : vector<8x8x120xf32> to vector<64x120xf32>
    %42 = arith.truncf %41 : vector<64x120xf32> to vector<64x120xbf16>
    %c2 = arith.constant 2 : index
    %c0_22 = arith.constant 0 : index
    %c0_23 = arith.constant 0 : index
    %43 = vector.load %arg3[%c2, %c0_22, %c0_23] : memref<3x120x8xbf16, #tpu.memory_space<vmem>>, vector<1x120x8xbf16>
    %44 = vector.shape_cast %43 : vector<1x120x8xbf16> to vector<120x8xbf16>
    %cst_24 = arith.constant dense<0.000000e+00> : vector<64x8xf32>
    %45 = tpu.matmul %42, %44, %cst_24 {dimension_numbers = #tpu.dot_dimension_numbers<[1], [0], [0], [1], [0, 0, 1, 1], [], []>} : vector<64x120xbf16>, vector<120x8xbf16>, vector<64x8xf32> -> vector<64x8xf32>
    %c0_25 = arith.constant 0 : index
    %c0_26 = arith.constant 0 : index
    %46 = vector.load %arg7[%c0_25, %c0_26] : memref<64x8xf32, #tpu.memory_space<vmem>>, vector<64x8xf32>
    %47 = arith.addf %46, %45 : vector<64x8xf32>
    %c0_27 = arith.constant 0 : index
    %c0_28 = arith.constant 0 : index
    %48 = vector.load %arg7[%c0_27, %c0_28] : memref<64x8xf32, #tpu.memory_space<vmem>>, vector<64x8xf32>
    tpu.vector_store %arg7[%c0_27, %c0_28], %47 {strides = array<i32>} : memref<64x8xf32, #tpu.memory_space<vmem>>, vector<64x8xf32>,
    %c0_29 = arith.constant 0 : index
    %c0_30 = arith.constant 0 : index
    %49 = vector.load %arg7[%c0_29, %c0_30] : memref<64x8xf32, #tpu.memory_space<vmem>>, vector<64x8xf32>
    %c0_31 = arith.constant 0 : index
    %c0_32 = arith.constant 0 : index
    %50 = vector.load %arg4[%c0_31, %c0_32] : memref<1x8xf32, #tpu.memory_space<vmem>>, vector<1x8xf32>
    %51 = vector.shape_cast %50 : vector<1x8xf32> to vector<8xf32>
    %52 = vector.shape_cast %51 : vector<8xf32> to vector<1x8xf32>
    %53 = vector.broadcast %52 : vector<1x8xf32> to vector<64x8xf32>
    %54 = arith.addf %49, %53 : vector<64x8xf32>
    %cst_33 = arith.constant 2.000000e-01 : f32
    %55 = vector.broadcast %cst_33 : f32 to vector<64x8xf32>
    %56 = arith.mulf %54, %55 : vector<64x8xf32>
    %c0_34 = arith.constant 0 : index
    %c0_35 = arith.constant 0 : index
    %c0_36 = arith.constant 0 : index
    %c0_37 = arith.constant 0 : index
    %57 = vector.load %arg5[%c0_34, %c0_35, %c0_36, %c0_37] : memref<1x8x8x8xbf16, #tpu.memory_space<vmem>>, vector<1x8x8x8xbf16>
    %58 = vector.shape_cast %57 : vector<1x8x8x8xbf16> to vector<8x8x8xbf16>
    %59 = arith.extf %58 : vector<8x8x8xbf16> to vector<8x8x8xf32>
    %60 = vector.shape_cast %59 : vector<8x8x8xf32> to vector<64x8xf32>
    %61 = arith.addf %56, %60 : vector<64x8xf32>
    %62 = vector.shape_cast %61 : vector<64x8xf32> to vector<8x8x8xf32>
    %63 = arith.truncf %62 : vector<8x8x8xf32> to vector<8x8x8xbf16>
    %c0_38 = arith.constant 0 : index
    %c0_39 = arith.constant 0 : index
    %c0_40 = arith.constant 0 : index
    %c0_41 = arith.constant 0 : index
    %64 = vector.load %arg6[%c0_38, %c0_39, %c0_40, %c0_41] : memref<1x8x8x8xbf16, #tpu.memory_space<vmem>>, vector<1x8x8x8xbf16>
    %65 = vector.shape_cast %64 : vector<1x8x8x8xbf16> to vector<8x8x8xbf16>
    %66 = vector.shape_cast %63 : vector<8x8x8xbf16> to vector<1x8x8x8xbf16>
    tpu.vector_store %arg6[%c0_38, %c0_39, %c0_40, %c0_41], %66 {strides = array<i32>} : memref<1x8x8x8xbf16, #tpu.memory_space<vmem>>, vector<1x8x8x8xbf16>,
    return
  }
  func.func @transform_0(%arg0: i32, %arg1: i32) -> (i32, i32, i32, i32, i32) {
    %c0_i32 = arith.constant 0 : i32
    %c0_i32_0 = arith.constant 0 : i32
    %c0_i32_1 = arith.constant 0 : i32
    %c0_i32_2 = arith.constant 0 : i32
    return %arg0, %arg1, %c0_i32, %c0_i32_0, %c0_i32_1 : i32, i32, i32, i32, i32
  }
  func.func @transform_1(%arg0: i32, %arg1: i32) -> (i32, i32, i32) {
    %c0_i32 = arith.constant 0 : i32
    %c0_i32_0 = arith.constant 0 : i32
    %c0_i32_1 = arith.constant 0 : i32
    %c0_i32_2 = arith.constant 0 : i32
    return %c0_i32, %c0_i32_0, %c0_i32_1 : i32, i32, i32
  }
  func.func @transform_2(%arg0: i32, %arg1: i32) -> (i32, i32) {
    %c0_i32 = arith.constant 0 : i32
    %c0_i32_0 = arith.constant 0 : i32
    %c0_i32_1 = arith.constant 0 : i32
    return %c0_i32, %c0_i32_0 : i32, i32
  }
  func.func @transform_3(%arg0: i32, %arg1: i32) -> (i32, i32, i32, i32) {
    %c0_i32 = arith.constant 0 : i32
    %c0_i32_0 = arith.constant 0 : i32
    %c0_i32_1 = arith.constant 0 : i32
    return %arg0, %arg1, %c0_i32, %c0_i32_0 : i32, i32, i32, i32
  }
  func.func @transform_4(%arg0: i32, %arg1: i32) -> (i32, i32, i32, i32) {
    %c0_i32 = arith.constant 0 : i32
    %c0_i32_0 = arith.constant 0 : i32
    %c0_i32_1 = arith.constant 0 : i32
    return %arg0, %arg1, %c0_i32, %c0_i32_0 : i32, i32, i32, i32
  }
}

</mosaic_0001>

<bundles_post_ra>
// kernel: tpu_custom_call.1
= control target key start
LH: loop header
LB: loop body
LE: loop exit
PB: predicated region body
PF: predicated region fallthrough
CT: control target
= control target key end

     0   :  { %v40_v0 = vlaneseq  ;;  %vm59_vm0 = vcmask 64512   ;;  %s218_s0 = inlined_call_operand.vmem [shape: f32[8,16,8], index: 0, kind: input, shape index: {}]   ;;  %s219_s1 = inlined_call_operand.vmem [shape: f32[8,16,8], index: 1, kind: output, shape index: {}]  }
   0x1   :  { %v8_v1 = vld [vmem:[%s218_s0] sm:$0xff]  ;;  %v9_v2 = vld [vmem:[%s218_s0 + $0x8] sm:$0xff]  ;;  %v10_v3 = vld [vmem:[%s218_s0 + $0x10] sm:$0xff] }
   0x2   :  { %v24_v4 = vrot.slane %v8_v1, 7  ;;  %v32_v5 = vrot.slane %v9_v2, 7  ;;  %v41_v6 = vshrl.u32 %v40_v0, 7  ;;  %v11_v7 = vld [vmem:[%s218_s0 + $0x18] sm:$0xff]  ;;  %v25_v8 = vrot.slane %v10_v3, 7  ;;  %v12_v9 = vld [vmem:[%s218_s0 + $0x20] sm:$0xff] }
   0x3   :  { %v33_v10 = vrot.slane %v11_v7, 7  ;;  %v13_v11 = vld [vmem:[%s218_s0 + $0x28] sm:$0xff]  ;;  %v26_v12 = vrot.slane %v12_v9, 7  ;;  %v14_v13 = vld [vmem:[%s218_s0 + $0x30] sm:$0xff]  ;;  %v15_v14 = vld [vmem:[%s218_s0 + $0x38] sm:$0xff] }
   0x4   :  { %vm42_vm1 = vcmp.lt.s32.totalorder %v41_v6, 1  ;;  %v34_v15 = vrot.slane %v13_v11, 7  ;;  %v27_v16 = vrot.slane %v14_v13, 7  ;;  %v35_v17 = vrot.slane %v15_v14, 7  ;;  %v16_v18 = vld [vmem:[%s218_s0 + $0x40] sm:$0xff]  ;;  %v17_v19 = vld [vmem:[%s218_s0 + $0x48] sm:$0xff] }
   0x5   :  { %v51_v20 = vsel %vm42_vm1, %v32_v5, %v24_v4  ;;  %v43_v21 = vsel %vm42_vm1, %v24_v4, %v32_v5  ;;  %v52_v22 = vsel %vm42_vm1, %v33_v10, %v25_v8  ;;  %v44_v23 = vsel %vm42_vm1, %v25_v8, %v33_v10  ;;  %v18_v24 = vld [vmem:[%s218_s0 + $0x50] sm:$0xff]  ;;  %v19_v25 = vld [vmem:[%s218_s0 + $0x58] sm:$0xff]  ;;  %v20_v26 = vld [vmem:[%s218_s0 + $0x60] sm:$0xff] }
   0x6   :  { %60 = vst.msk [vmem:[%s219_s1] sm:$0xff] %vm59_vm0, %v51_v20  ;;  %61 = vst.msk [vmem:[%s219_s1 + $0x8] sm:$0xff] %vm59_vm0, %v43_v21  ;;  %v53_v27 = vsel %vm42_vm1, %v34_v15, %v26_v12  ;;  %v45_v28 = vsel %vm42_vm1, %v26_v12, %v34_v15  ;;  %v54_v29 = vsel %vm42_vm1, %v35_v17, %v27_v16  ;;  %v21_v31 = vld [vmem:[%s218_s0 + $0x68] sm:$0xff]  ;;  %v22_v32 = vld [vmem:[%s218_s0 + $0x70] sm:$0xff]  ;;  %v28_v34 = vrot.slane %v16_v18, 7 }
   0x7   :  { %62 = vst.msk [vmem:[%s219_s1 + $0x10] sm:$0xff] %vm59_vm0, %v52_v22  ;;  %63 = vst.msk [vmem:[%s219_s1 + $0x18] sm:$0xff] %vm59_vm0, %v44_v23  ;;  %v46_v30 = vsel %vm42_vm1, %v27_v16, %v35_v17  ;;  %v23_v33 = vld [vmem:[%s218_s0 + $0x78] sm:$0xff]  ;;  %v36_v35 = vrot.slane %v17_v19, 7  ;;  %v29_v36 = vrot.slane %v18_v24, 7  ;;  %v37_v37 = vrot.slane %v19_v25, 7 }
   0x8   :  { %64 = vst.msk [vmem:[%s219_s1 + $0x20] sm:$0xff] %vm59_vm0, %v53_v27  ;;  %65 = vst.msk [vmem:[%s219_s1 + $0x28] sm:$0xff] %vm59_vm0, %v45_v28  ;;  %v30_v38 = vrot.slane %v20_v26, 7  ;;  %v38_v39 = vrot.slane %v21_v31, 7  ;;  %v31_v40 = vrot.slane %v22_v32, 7  ;;  %v39_v41 = vrot.slane %v23_v33, 7 }
   0x9   :  { %66 = vst.msk [vmem:[%s219_s1 + $0x30] sm:$0xff] %vm59_vm0, %v54_v29  ;;  %67 = vst.msk [vmem:[%s219_s1 + $0x38] sm:$0xff] %vm59_vm0, %v46_v30  ;;  %v55_v42 = vsel %vm42_vm1, %v36_v35, %v28_v34  ;;  %v47_v43 = vsel %vm42_vm1, %v28_v34, %v36_v35  ;;  %v56_v44 = vsel %vm42_vm1, %v37_v37, %v29_v36 }
   0xa   :  { %v48_v45 = vsel %vm42_vm1, %v29_v36, %v37_v37  ;;  %68 = vst.msk [vmem:[%s219_s1 + $0x40] sm:$0xff] %vm59_vm0, %v55_v42  ;;  %69 = vst.msk [vmem:[%s219_s1 + $0x48] sm:$0xff] %vm59_vm0, %v47_v43  ;;  %v57_v46 = vsel %vm42_vm1, %v38_v39, %v30_v38  ;;  %v49_v47 = vsel %vm42_vm1, %v30_v38, %v38_v39 }
   0xb   :  { %70 = vst.msk [vmem:[%s219_s1 + $0x50] sm:$0xff] %vm59_vm0, %v56_v44  ;;  %71 = vst.msk [vmem:[%s219_s1 + $0x58] sm:$0xff] %vm59_vm0, %v48_v45  ;;  %v58_v48 = vsel %vm42_vm1, %v39_v41, %v31_v40  ;;  %v50_v49 = vsel %vm42_vm1, %v31_v40, %v39_v41 }
   0xc   :  { %72 = vst.msk [vmem:[%s219_s1 + $0x60] sm:$0xff] %vm59_vm0, %v57_v46  ;;  %73 = vst.msk [vmem:[%s219_s1 + $0x68] sm:$0xff] %vm59_vm0, %v49_v47 }
   0xd   :  { %74 = vst.msk [vmem:[%s219_s1 + $0x70] sm:$0xff] %vm59_vm0, %v58_v48  ;;  %75 = vst.msk [vmem:[%s219_s1 + $0x78] sm:$0xff] %vm59_vm0, %v50_v49 }

// kernel: tpu_custom_call.1
= control target key start
LH: loop header
LB: loop body
LE: loop exit
PB: predicated region body
PF: predicated region fallthrough
CT: control target
= control target key end

     0   :  { %9 = vsyncpa [#allocation4], 0  ;;  %s1957_s0 = inlined_call_operand.vmem [shape: bf16[2,1,10,8,40], index: 0, kind: input, shape index: {}]   ;;  %s1958_s1 = inlined_call_operand.vmem [shape: bf16[3,120,8], index: 1, kind: input, shape index: {}]   ;;  %s1959_s2 = inlined_call_operand.vmem [shape: f32[1,8], index: 2, kind: input, shape index: {}]   ;;  %s1960_s3 = inlined_call_operand.vmem [shape: bf16[2,8,8,8], index: 3, kind: input, shape index: {}]   ;;  %s1961_s4 = inlined_call_operand.hbm [shape: bf16[2,8,8,8], index: 4, kind: output, shape index: {}]  }
   0x1   :  { %11 = vsyncpa [#allocation4 + $0x1], 0  ;;  %s1591_s15 = smov 0   ;;  %s1593_s16 = smov 0  }
   0x2   :  { %s1595_s17 = smov 0   ;;  %s1597_s18 = smov 0  }
   0x3   :  { %s1599_s19 = smov 0   ;;  %s1601_s20 = smov 0  }
   0x4 LB: > { %s1115_s21 = sadd.s32 4294967295, %s1559_s20   ;;  %s1116_s22 = sadd.s32 4294967294, %s1559_s20   ;;  %s1559_s20 = sphi %s1601_s20, %s17_s20   ;;  %s1555_s19 = sphi %s1599_s19, %s1968_s19   ;;  %s1551_s18 = sphi %s1597_s18, %s1967_s18   ;;  %s1547_s17 = sphi %s1595_s17, %s1966_s17   ;;  %s1543_s16 = sphi %s1593_s16, %s1965_s16   ;;  %s1539_s15 = sphi %s1591_s15, %s1964_s15  }
   0x5   : > { %s29_s23 = sadd.s32 1, %s1555_s19  ;;  %s136_s24 = sadd.s32 1, %s1547_s17 }
   0x6   : > { %p31_p0 = scmp.ge.s32.totalorder %s29_s23, 2  ;;  %p146_p1 = scmp.ne.s32.totalorder %s1547_s17, %s1543_s16 }
   0x7   : > { %p147_p2 = scmp.eq.s32.totalorder %s1115_s21, 1  ;;  %p152_p3 = scmp.ne.s32.totalorder %s1543_s16, %s1539_s15 }
   0x8   : > { %s1970_s23 = smov (%p31_p0, %s29_s23), 0  ;;  %p153_p5 = scmp.eq.s32.totalorder %s1116_s22, 1 }
   0x9   : > { %p1631_p4 = por %p147_p2, %p146_p1  ;;  %s131_s26 = ssub.s32 %s1555_s19, %s1970_s23 }
   0xa   : > { %p1119_p6 = scmp.ge.s32.totalorder %s1559_s20, 1  ;;  %p134_p7 = scmp.eq.s32.totalorder %s131_s26, 0 }
   0xb   : > { %p1638_p8 = por %p153_p5, %p152_p3  ;;  %p202_p9 = scmp.lt.s32.totalorder %s1559_s20, 3 }
   0xc   : > { %s1644_s28 = scalar_select %p134_p7, %s1547_s17, %s136_s24  }
   0xd   : > { %p203_p10 = pnand %p1119_p6, %p202_p9 }
   0xe   : > { %p241_p11 = scmp.lt.s32.totalorder (!%p203_p10), %s1551_s18, 1  ;;  %s1561_s30 = smov (!%p203_p10), 40  }
   0xf   : > { %206 = sbr.rel (%p203_p10) target bundleno = 422 (0x1a6), region = 36  ;;  %s1562_s14 = smov (!%p203_p10), 80  }
  0x10   : > { %s238_s29 = sand.u32 (!%p203_p10), 1, %s1543_s16   ;;  %s1197_s6 = sshll.u32 (!%p203_p10), %s1551_s18, 9 }
  0x11   : > { %s1903_s11 = scalar_lea.hbm (!%p203_p10), %s1961_s4, %s1197_s6  ;;  %s1563_s13 = smov (!%p203_p10), [#allocation3]  }
  0x14   : > { %vm491_vm0 = vcmask 1043456   ;;  %v1459_v0 = vld [vmem:[%s1958_s1 + $0x38] ss:$0 sps:$4 sm:$0xff]   ;;  %v1461_v1 = vld [vmem:[%s1958_s1 + $0x30] sm:$0xff]   ;;  %s1654_s7 = scalar_select %p241_p11, %s1551_s18, 1  ;;  %v1463_v6 = vld [vmem:[%s1958_s1 + $0x28] sm:$0xff]  }
  0x15   : > { %v1460_v2 = vld [vmem:[%s1958_s1 + $0x74] ss:$0 sps:$4 sm:$0xff]   ;;  %v1462_v3 = vld [vmem:[%s1958_s1 + $0x6c] sm:$0xff]   ;;  %1365 = vmatprep.subr.msk.bf16.mxu0 %vm491_vm0, %v1459_v0  ;;  %v493_v4 = vsel %vm491_vm0, %v1459_v0, 0  ;;  %v1464_v7 = vld [vmem:[%s1958_s1 + $0x64] sm:$0xff]   ;;  %vm331_vm1 = vcmask 1046528  }
  0x16   : > { %s1369_s12 = smul.u32 40, %s1654_s7  ;;  %1278 = vmatpush3.bf16.msra.mxu0 %v493_v4  ;;  %1366 = vmatprep.subr.msk.bf16.mxu1 %vm491_vm0, %v1460_v2  ;;  %v663_v5 = vsel %vm491_vm0, %v1460_v2, 0  ;;  %v1465_v16 = vld [vmem:[%s1958_s1 + $0x20] sm:$0xff]   ;;  %v1467_v33 = vld [vmem:[%s1958_s1 + $0x18] sm:$0xff]   ;;  %v1469_v41 = vld [vmem:[%s1958_s1 + $0x10] sm:$0xff]   ;;  %vm306_vm2 = vcmask 1040384  }
  0x17   : > { %1302 = vmatpush3.bf16.msra.mxu1 %v663_v5  ;;  %1279 = vmatprep.subr.bf16.mxu0 %v1461_v1  ;;  %v1466_v21 = vld [vmem:[%s1958_s1 + $0x5c] sm:$0xff]   ;;  %v1468_v34 = vld [vmem:[%s1958_s1 + $0x54] sm:$0xff]   ;;  %v1470_v42 = vld [vmem:[%s1958_s1 + $0x4c] sm:$0xff]   ;;  %vm396_vm3 = vcmask 326656   ;;  %vm405_vm4 = vcmask 654336   ;;  %vm478_vm5 = vcmask 982016  }
  0x18   : > { %s1673_s24 = scalar_lea.vmem %s1957_s0, %s1369_s12  ;;  %1303 = vmatprep.subr.bf16.mxu1 %v1462_v3  ;;  %v1471_v47 = vld [vmem:[%s1958_s1 + $0x8] sm:$0xff]   ;;  %v1475_v50 = vld [vmem:[%s1958_s1 + $0xb0] ss:$0 sps:$4 sm:$0xff]   ;;  %v1473_v55 = vld [vmem:[%s1958_s1] sm:$0xff]   ;;  %vm560_vm6 = vcmask 64512   ;;  %s1196_s21 = sshll.u32 %s1654_s7, 5 }
  0x19   : > { %v1235_v8 = vld [vmem:[%s1673_s24 + $0x10] sm:$0xff]   ;;  %v1199_v9 = vld [vmem:[%s1673_s24] sm:$0xff]   ;;  %v1234_v11 = vld [vmem:[%s1673_s24 + $0x8] sm:$0xff]   ;;  %v1767_v56 = vsel %vm491_vm0, %v1475_v50, 0  ;;  %s258_s22 = scalar_lea.vmem %s1960_s3, %s1196_s21  ;;  %vm990_vm7 = vcmask 60416   ;;  %s1912_s18 = scalar_lea.sflag [#allocation4], %s238_s29 }
  0x1a   : > { %v1680_v10 = vunpack.c.l.bf16 %v1235_v8  ;;  %1280 = vmatpush3.bf16.msra.mxu0 %v1461_v1  ;;  %v1683_v12 = vunpack.c.l.bf16 %v1199_v9  ;;  %v1685_v13 = vunpack.c.h.bf16 %v1199_v9  ;;  %v1689_v14 = vunpack.c.l.bf16 %v1234_v11  ;;  %v1236_v20 = vld [vmem:[%s1673_s24 + $0x18] sm:$0xff]   ;;  %v1237_v39 = vld [vmem:[%s1673_s24 + $0x20] sm:$0xff]   ;;  %s1120_s24 = sshll.u32 %s238_s29, 5  ;;  %s1487_s21 = sshll.u32 %s1563_s13, 4  ;;  %s1488_s21 = int_to_ptr.vmem [resolvable:$false] %s1487_s21 }
  0x1b   : > { %1304 = vmatpush3.bf16.msra.mxu1 %v1462_v3  ;;  %1281 = vmatprep.subr.bf16.mxu0 %v1463_v6  ;;  %v1691_v15 = vunpack.c.h.bf16 %v1234_v11  ;;  %v1704_v22 = vunpack.c.h.bf16 %v1235_v8  ;;  %v1716_v32 = vunpack.c.l.bf16 %v1236_v20  ;;  %v1727_v37 = vunpack.c.h.bf16 %v1236_v20  ;;  %v1472_v49 = vld [vmem:[%s1958_s1 + $0x44] sm:$0xff]   ;;  %v1474_v57 = vld [vmem:[%s1958_s1 + $0x3c] sm:$0xff]   ;;  %s240_s5 = scalar_lea.vmem [#allocation3], %s1120_s24 }
  0x1c   : > { %348 = vrot.lane.b32.xlu1 %v1680_v10, %s1561_s30  ;;  %1305 = vmatprep.subr.bf16.mxu1 %v1464_v7  ;;  %v1429_v17 = vpack.i.bf16 %v1685_v13, %v1683_v12  ;;  %v315_v18 = vrot.slane %v1683_v12, 1  ;;  %v316_v19 = vrot.slane %v1685_v13, 1  ;;  %v317_v23 = vrot.slane %v1689_v14, 1  ;;  %s1015_s8 = sshll.u32 %s240_s5, 4  ;;  %s1905_s8 = int_to_ptr.vmem [resolvable:$true] %s1015_s8 }
  0x1d   : > { %v318_v24 = vrot.slane %v1691_v15, 1  ;;  %v1434_v27 = vpack.i.bf16 %v1691_v15, %v1689_v14  ;;  %v319_v28 = vrot.slane %v1680_v10, 1  ;;  %v320_v38 = vrot.slane %v1704_v22, 1  ;;  %s1483_s12 = scalar_lea.vmem %s1905_s8, 512  ;;  %p1490_p1 = scmp.lt.s32.totalorder %s1905_s8, %s1488_s21 }
  0x1e   : > { %1282 = vmatpush3.bf16.msra.mxu0 %v1463_v6  ;;  %1430 = vrot.lane.b32.xlu0 %v1429_v17, %s1561_s30  ;;  %v332_v25 = vsel %vm331_vm1, %v315_v18, 0.0  ;;  %v333_v26 = vsel %vm331_vm1, %v316_v19, 0.0  ;;  %v334_v30 = vsel %vm331_vm1, %v317_v23, 0.0  ;;  %v321_v40 = vrot.slane %v1716_v32, 1  ;;  %p1484_p12 = scmp.ne.s32.totalorder %s1905_s8, %s1483_s12 }
  0x1f   : > { %1306 = vmatpush3.bf16.msra.mxu1 %v1464_v7  ;;  %v1439_v29 = vpack.i.bf16 %v333_v26, %v332_v25  ;;  %v335_v31 = vsel %vm331_vm1, %v318_v24, 0.0  ;;  %1283 = vmatprep.subr.bf16.mxu0 %v1465_v16  ;;  %v336_v35 = vsel %vm331_vm1, %v319_v28, 0.0  ;;  %v1449_v43 = vpack.i.bf16 %v1716_v32, %v1704_v22 }
  0x20   : > { %1307 = vmatprep.subr.bf16.mxu1 %v1466_v21  ;;  %v1444_v36 = vpack.i.bf16 %v335_v31, %v334_v30  ;;  %v337_v44 = vsel %vm331_vm1, %v320_v38, 0.0  ;;  %v322_v45 = vrot.slane %v1727_v37, 1  ;;  %v1744_v46 = vunpack.c.l.bf16 %v1237_v39  ;;  %p1485_p13 = pnand %p1484_p12, %p1631_p4 }
  0x21   : > { %1440 = vrot.lane.b32.xlu1 %v1439_v29, %s1562_s14  ;;  %v338_v48 = vsel %vm331_vm1, %v321_v40, 0.0  ;;  %v1758_v51 = vunpack.c.h.bf16 %v1237_v39  ;;  %v290_v62 = vrot.slane %v1683_v12, 7  ;;  %v291_v63 = vrot.slane %v1685_v13, 7 }
  0x22   : > { %1284 = vmatpush3.bf16.msra.mxu0 %v1465_v16  ;;  %1435 = vrot.lane.b32.xlu0 %v1434_v27, %s1561_s30  ;;  %v1454_v52 = vpack.i.bf16 %v338_v48, %v337_v44  ;;  %v339_v53 = vsel %vm331_vm1, %v322_v45, 0.0  ;;  %v573_v54 = vrot.slane %v1744_v46, 1  ;;  %v294_v1 = vrot.slane %v1680_v10, 7  ;;  %p1486_p0 = pneg %p1485_p13 }
  0x23   : > { %1308 = vmatpush3.bf16.msra.mxu1 %v1466_v21  ;;  %1285 = vmatprep.subr.bf16.mxu0 %v1467_v33  ;;  %v758_v59 = vrot.slane %v1758_v51, 1  ;;  %v307_v4 = vsel %vm306_vm2, 0.0, %v290_v62  ;;  %v308_v5 = vsel %vm306_vm2, 0.0, %v291_v63  ;;  %v292_v7 = vrot.slane %v1689_v14, 7 }
  0x24   : > { %1309 = vmatprep.subr.bf16.mxu1 %v1468_v34  ;;  %v575_v58 = vsel %vm331_vm1, %v573_v54, 0.0  ;;  %v293_v8 = vrot.slane %v1691_v15, 7  ;;  %v311_v13 = vsel %vm306_vm2, 0.0, %v294_v1  ;;  %v297_v24 = vrot.slane %v1727_v37, 7  ;;  %v1477_v54 = vld [vmem:[%s1958_s1 + $0xa0] sm:$0xff]  }
  0x25   : > { %380 = vrot.lane.b32.xlu1 %v336_v35, %s1562_s14  ;;  %v760_v60 = vsel %vm331_vm1, %v758_v59, 0.0  ;;  %v309_v14 = vsel %vm306_vm2, 0.0, %v292_v7  ;;  %v295_v28 = vrot.slane %v1704_v22, 7  ;;  %v296_v29 = vrot.slane %v1716_v32, 7  ;;  %v1476_v32 = vld [vmem:[%s1958_s1 + $0xa8] sm:$0xff]   ;;  %v1479_v7 = vld [vmem:[%s1958_s1 + $0x90] sm:$0xff]  }
  0x26   : > { %1286 = vmatpush3.bf16.msra.mxu0 %v1467_v33  ;;  %1445 = vrot.lane.b32.xlu0 %v1444_v36, %s1562_s14  ;;  %v310_v15 = vsel %vm306_vm2, 0.0, %v293_v8  ;;  %v570_v48 = vrot.slane %v1744_v46, 7  ;;  %v755_v59 = vrot.slane %v1758_v51, 7 }
  0x27   : > { %1310 = vmatpush3.bf16.msra.mxu1 %v1468_v34  ;;  %1287 = vmatprep.subr.bf16.mxu0 %v1469_v41  ;;  %v313_v45 = vsel %vm306_vm2, 0.0, %v296_v29 }
  0x28   : > { %1311 = vmatprep.subr.bf16.mxu1 %v1470_v42 }
  0x29   : > { %354 = vrot.lane.b32.xlu1 %v1727_v37, %s1561_s30  ;;  %v314_v37 = vsel %vm306_vm2, 0.0, %v297_v24 }
  0x2a   : > { %1288 = vmatpush3.bf16.msra.mxu0 %v1469_v41  ;;  %1450 = vrot.lane.b32.xlu0 %v1449_v43, %s1561_s30 }
  0x2b   : > { %1312 = vmatpush3.bf16.msra.mxu1 %v1470_v42  ;;  %1289 = vmatprep.subr.bf16.mxu0 %v1471_v47  ;;  %v312_v42 = vsel %vm306_vm2, 0.0, %v295_v28 }
  0x2c   : > { %1313 = vmatprep.subr.bf16.mxu1 %v1472_v49 }
  0x2d   : > { %386 = vrot.lane.b32.xlu1 %v339_v53, %s1562_s14 }
  0x2e   : > { %1290 = vmatpush3.bf16.msra.mxu0 %v1471_v47  ;;  %1455 = vrot.lane.b32.xlu0 %v1454_v52, %s1562_s14 }
  0x2f   : > { %1314 = vmatpush3.bf16.msra.mxu1 %v1472_v49  ;;  %1291 = vmatprep.subr.bf16.mxu0 %v1473_v55 }
  0x30   : > { %1315 = vmatprep.subr.bf16.mxu1 %v1474_v57 }
  0x31   : > { %580 = vrot.lane.b32.xlu1 %v575_v58, %s1562_s14  ;;  %v572_v58 = vsel %vm306_vm2, 0.0, %v570_v48 }
  0x32   : > { %1292 = vmatpush3.bf16.msra.mxu0 %v1473_v55  ;;  %576 = vrot.lane.b32.xlu0 %v1744_v46, %s1561_s30 }
  0x33   : > { %1316 = vmatpush3.bf16.msra.mxu1 %v1474_v57  ;;  %1367 = vmatprep.subr.msk.bf16.mxu0 %vm491_vm0, %v1475_v50 }
  0x34   : > { %1368 = vmatprep.subr.msk.bf16.mxu1 %vm491_vm0, %v1475_v50 }
  0x35   : > { %765 = vrot.lane.b32.xlu1 %v760_v60, %s1562_s14 }
  0x36   : > { %761 = vrot.lane.b32.xlu0 %v1758_v51, %s1561_s30  ;;  %v1478_v51 = vld [vmem:[%s1958_s1 + $0x98] sm:$0xff]   ;;  %s1489_s30 = scalar_lea.vmem %s1488_s21, 1024 }
  0x37   : > { %p1491_p2 = scmp.lt.s32.totalorder %s1489_s30, %s1483_s12 }
  0x39   : > { %p1492_p3 = por %p1491_p2, %p1490_p1 }
  0x3b   : > { %p1493_p5 = pnand %p1492_p3, %p1486_p0 }
  0x8e   : > { %v349_v61 = vpop.permute.xlu1 %348 }
  0x8f   : > { %v401_v30 = vsel %vm396_vm3, %v311_v13, %v349_v61  ;;  %v1480_v13 = vld [vmem:[%s1958_s1 + $0x88] sm:$0xff]  }
  0x90   : > { %v1431_v0 = vpop.permute.xlu0 %1430 }
  0x91   : > { %v1433_v2 = vunpack.i.h.bf16 %v1431_v0  ;;  %v1432_v3 = vunpack.i.l.bf16 %v1431_v0 }
  0x93   : > { %v1441_v6 = vpop.permute.xlu1 %1440  ;;  %v397_v10 = vsel %vm396_vm3, %v307_v4, %v1432_v3  ;;  %v398_v16 = vsel %vm396_vm3, %v308_v5, %v1433_v2  ;;  %v757_v4 = vsel %vm306_vm2, 0.0, %v755_v59 }
  0x94   : > { %v1443_v9 = vunpack.i.h.bf16 %v1441_v6  ;;  %v1442_v11 = vunpack.i.l.bf16 %v1441_v6  ;;  %v1436_v12 = vpop.permute.xlu0 %1435 }
  0x95   : > { %v1438_v17 = vunpack.i.h.bf16 %v1436_v12  ;;  %v1437_v18 = vunpack.i.l.bf16 %v1436_v12 }
  0x96   : > { %v406_v19 = vsel %vm405_vm4, %v397_v10, %v1442_v11  ;;  %v407_v20 = vsel %vm405_vm4, %v398_v16, %v1443_v9  ;;  %v1481_v10 = vld [vmem:[%s1958_s1 + $0x80] sm:$0xff]   ;;  %v1482_v16 = vld [vmem:[%s1958_s1 + $0x78] sm:$0xff]  }
  0x97   : > { %v381_v21 = vpop.permute.xlu1 %380  ;;  %v414_v23 = vpack.c.bf16 %v407_v20, %v406_v19  ;;  %v400_v31 = vsel %vm396_vm3, %v310_v15, %v1438_v17  ;;  %v399_v33 = vsel %vm396_vm3, %v309_v14, %v1437_v18 }
  0x98   : > { %v1446_v25 = vpop.permute.xlu0 %1445  ;;  %v410_v34 = vsel %vm405_vm4, %v401_v30, %v381_v21 }
  0x99   : > { %v1448_v26 = vunpack.i.h.bf16 %v1446_v25  ;;  %v1447_v27 = vunpack.i.l.bf16 %v1446_v25  ;;  %1293 = vmatprep.mubr.msk.bf16.mxu0 %vm478_vm5, %v414_v23 }
  0x9b   : > { %v408_v35 = vsel %vm405_vm4, %v399_v33, %v1447_v27  ;;  %v409_v36 = vsel %vm405_vm4, %v400_v31, %v1448_v26  ;;  %v355_v38 = vpop.permute.xlu1 %354 }
  0x9c   : > { %v415_v39 = vpack.c.bf16 %v409_v36, %v408_v35  ;;  %v586_v40 = vpack.c.bf16 %v410_v34, %v409_v36  ;;  %v1451_v22 = vpop.permute.xlu0 %1450  ;;  %v585_v41 = vpack.c.bf16 %v408_v35, %v407_v20  ;;  %v404_v47 = vsel %vm396_vm3, %v314_v37, %v355_v38 }
  0x9d   : > { %v1453_v43 = vunpack.i.h.bf16 %v1451_v22  ;;  %v1452_v44 = vunpack.i.l.bf16 %v1451_v22 }
  0x9e   : > { %1294 = vmatmul.mubr.msk.bf16.vlgmr.msra.gmra.mxu0 %vm478_vm5, %v415_v39  ;;  %1317 = vmatprep.mubr.msk.bf16.mxu1 %vm478_vm5, %v585_v41 }
  0x9f   : > { %1326 = vmatpush3.bf16.msra.mxu0 %v1767_v56  ;;  %1318 = vmatmul.mubr.msk.bf16.vlgmr.msra.gmra.mxu1 %vm478_vm5, %v586_v40  ;;  %v387_v49 = vpop.permute.xlu1 %386  ;;  %v402_v50 = vsel %vm396_vm3, %v312_v42, %v1452_v44  ;;  %v403_v53 = vsel %vm396_vm3, %v313_v45, %v1453_v43 }
  0xa0   : > { %1357 = vmatpush3.bf16.msra.mxu1 %v1767_v56  ;;  %v1456_v52 = vpop.permute.xlu0 %1455  ;;  %1327 = vmatprep.subr.bf16.mxu0 %v1476_v32  ;;  %v413_v46 = vsel %vm405_vm4, %v404_v47, %v387_v49 }
  0xa1   : > { %v1458_v55 = vunpack.i.h.bf16 %v1456_v52  ;;  %v1457_v57 = vunpack.i.l.bf16 %v1456_v52  ;;  %1350 = vmatprep.subr.bf16.mxu1 %v1476_v32 }
  0xa3   : > { %v411_v60 = vsel %vm405_vm4, %v402_v50, %v1457_v57  ;;  %v412_v56 = vsel %vm405_vm4, %v403_v53, %v1458_v55  ;;  %1328 = vmatpush3.bf16.msra.mxu0 %v1476_v32  ;;  %v581_v61 = vpop.permute.xlu1 %580 }
  0xa4   : > { %v416_v62 = vpack.c.bf16 %v411_v60, %v410_v34  ;;  %v587_v63 = vpack.c.bf16 %v412_v56, %v411_v60  ;;  %v417_v0 = vpack.c.bf16 %v413_v46, %v412_v56  ;;  %1358 = vmatpush3.bf16.msra.mxu1 %v1476_v32  ;;  %v577_v1 = vpop.permute.xlu0 %576  ;;  %1329 = vmatprep.subr.bf16.mxu0 %v1477_v54 }
  0xa5   : > { %v583_v2 = vsel %vm396_vm3, %v572_v58, %v577_v1  ;;  %1351 = vmatprep.subr.bf16.mxu1 %v1477_v54 }
  0xa6   : > { %v584_v3 = vsel %vm405_vm4, %v583_v2, %v581_v61  ;;  %1297 = vmatprep.mubr.msk.bf16.mxu0 %vm478_vm5, %v416_v62  ;;  %1321 = vmatprep.mubr.msk.bf16.mxu1 %vm478_vm5, %v587_v63 }
  0xa7   : > { %v588_v5 = vpack.c.bf16 %v584_v3, %v413_v46  ;;  %1330 = vmatpush3.bf16.msra.mxu0 %v1477_v54  ;;  %v766_v6 = vpop.permute.xlu1 %765 }
  0xa8   : > { %1298 = vmatmul.mubr.msk.bf16.gmra.mxu0 %vm478_vm5, %v417_v0  ;;  %1359 = vmatpush3.bf16.msra.mxu1 %v1477_v54  ;;  %v762_v8 = vpop.permute.xlu0 %761 }
  0xa9   : > { %1341 = vmatprep.mubr.msk.bf16.mxu0 %vm478_vm5, %v415_v39  ;;  %1322 = vmatmul.mubr.msk.bf16.gmra.mxu1 %vm478_vm5, %v588_v5  ;;  %v768_v9 = vsel %vm396_vm3, %v757_v4, %v762_v8 }
  0xaa   : > { %1331 = vmatprep.subr.bf16.mxu0 %v1478_v51  ;;  %1352 = vmatprep.subr.bf16.mxu1 %v1478_v51  ;;  %v769_v11 = vsel %vm405_vm4, %v768_v9, %v766_v6  ;;  %v1238_v6 = vld [vmem:[%s258_s22 + $0x8] sm:$0xff]   ;;  %v1219_v9 = vld [vmem:[%s258_s22] sm:$0xff]  }
  0xab   : > { %1332 = vmatpush3.bf16.msra.mxu0 %v1478_v51  ;;  %1345 = vmatprep.mubr.msk.bf16.mxu1 %vm478_vm5, %v417_v0  ;;  %v770_v12 = vpack.c.bf16 %v769_v11, %v584_v3  ;;  %v1240_v11 = vld [vmem:[%s258_s22 + $0x18] sm:$0xff]  }
  0xac   : > { %1360 = vmatpush3.bf16.msra.mxu1 %v1478_v51  ;;  %1333 = vmatprep.subr.bf16.mxu0 %v1479_v7 }
  0xad   : > { %1353 = vmatprep.subr.bf16.mxu1 %v1479_v7 }
  0xaf   : > { %1334 = vmatpush3.bf16.msra.mxu0 %v1479_v7 }
  0xb0   : > { %1361 = vmatpush3.bf16.msra.mxu1 %v1479_v7  ;;  %1335 = vmatprep.subr.bf16.mxu0 %v1480_v13  ;;  %v1190_v7 = vld [vmem:[%s1959_s2] ss:$0 sm:$0xff] }
  0xb1   : > { %1354 = vmatprep.subr.bf16.mxu1 %v1480_v13 }
  0xb3   : > { %1336 = vmatpush3.bf16.msra.mxu0 %v1480_v13 }
  0xb4   : > { %1362 = vmatpush3.bf16.msra.mxu1 %v1480_v13  ;;  %1337 = vmatprep.subr.bf16.mxu0 %v1481_v10  ;;  %v1224_v13 = vunpack.c.l.bf16 %v1238_v6 }
  0xb5   : > { %1355 = vmatprep.subr.bf16.mxu1 %v1481_v10 }
  0xb7   : > { %1338 = vmatpush3.bf16.msra.mxu0 %v1481_v10 }
  0xb8   : > { %1363 = vmatpush3.bf16.msra.mxu1 %v1481_v10  ;;  %1339 = vmatprep.subr.bf16.mxu0 %v1482_v16  ;;  %v1239_v10 = vld [vmem:[%s258_s22 + $0x10] sm:$0xff]  }
  0xb9   : > { %1356 = vmatprep.subr.bf16.mxu1 %v1482_v16 }
  0xbb   : > { %1340 = vmatpush3.bf16.msra.mxu0 %v1482_v16 }
  0xbc   : > { %1364 = vmatpush3.bf16.msra.mxu1 %v1482_v16 }
  0xbe   : > { %1342 = vmatmul.mubr.msk.bf16.vlgmr.msra.gmra.mxu0 %vm478_vm5, %v416_v62 }
  0xbf   : > { %1346 = vmatmul.mubr.msk.bf16.vlgmr.msra.gmra.mxu1 %vm478_vm5, %v770_v12 }
 0x15e   : > { %v1295_v17 = vpop.f32.mrf.mxu0 }
 0x15f   : > { %563 = vst.msk [vmem:[#allocation2 + $0x10] sm:$0xff] %vm560_vm6, %v1295_v17  ;;  %v1319_v18 = vpop.f32.mrf.mxu1 }
 0x160   : > { %v529_v19 = vpop.f32.mrf.mxu0 }
 0x161   : > { %561 = vst.msk [vmem:[#allocation2] sm:$0xff] %vm560_vm6, %v529_v19  ;;  %v699_v20 = vpop.f32.mrf.mxu1  ;;  %v1232_v19 = vunpack.c.l.bf16 %v1240_v11 }
 0x162   : > { %v1296_v14 = vpop.f32.mrf.mxu0 }
 0x163   : > { %564 = vst.msk [vmem:[#allocation2 + $0x18] sm:$0xff] %vm560_vm6, %v1296_v14  ;;  %v1320_v15 = vpop.f32.mrf.mxu1 }
 0x164   : > { %v532_v21 = vpop.f32.mrf.mxu0 }
 0x165   : > { %562 = vst.msk [vmem:[#allocation2 + $0x8] sm:$0xff] %vm560_vm6, %v532_v21  ;;  %v702_v26 = vpop.f32.mrf.mxu1  ;;  %v1225_v21 = vunpack.c.h.bf16 %v1238_v6 }
 0x166   : > { %v732_v23 = vld [vmem:[#allocation2 + $0x10] sm:$0xff] }
 0x167   : > { %v740_v24 = vadd.f32 %v1319_v18, %v732_v23  ;;  %v1220_v18 = vunpack.c.l.bf16 %v1219_v9 }
 0x168   : > { %v730_v25 = vld [vmem:[#allocation2] sm:$0xff]  ;;  %v1299_v27 = vpop.f32.mrf.mxu0 }
 0x169   : > { %748 = vst.msk [vmem:[#allocation2 + $0x10] sm:$0xff] %vm560_vm6, %v740_v24  ;;  %v738_v28 = vadd.f32 %v730_v25, %v699_v20  ;;  %567 = vst.msk [vmem:[#allocation2 + $0x30] sm:$0xff] %vm560_vm6, %v1299_v27  ;;  %v1323_v31 = vpop.f32.mrf.mxu1  ;;  %v1229_v27 = vunpack.c.h.bf16 %v1239_v10 }
 0x16a   : > { %v733_v29 = vld [vmem:[#allocation2 + $0x18] sm:$0xff]  ;;  %v545_v30 = vpop.f32.mrf.mxu0 }
 0x16b   : > { %746 = vst.msk [vmem:[#allocation2] sm:$0xff] %vm560_vm6, %v738_v28  ;;  %v741_v33 = vadd.f32 %v1320_v15, %v733_v29  ;;  %565 = vst.msk [vmem:[#allocation2 + $0x20] sm:$0xff] %vm560_vm6, %v545_v30  ;;  %v715_v37 = vpop.f32.mrf.mxu1  ;;  %v1221_v15 = vunpack.c.h.bf16 %v1219_v9 }
 0x16c   : > { %v731_v34 = vld [vmem:[#allocation2 + $0x8] sm:$0xff]  ;;  %v1300_v35 = vpop.f32.mrf.mxu0 }
 0x16d   : > { %749 = vst.msk [vmem:[#allocation2 + $0x18] sm:$0xff] %vm560_vm6, %v741_v33  ;;  %v739_v36 = vadd.f32 %v731_v34, %v702_v26  ;;  %568 = vst.msk [vmem:[#allocation2 + $0x38] sm:$0xff] %vm560_vm6, %v1300_v35  ;;  %v1324_v41 = vpop.f32.mrf.mxu1  ;;  %v1228_v26 = vunpack.c.l.bf16 %v1239_v10 }
 0x16e   : > { %v548_v38 = vpop.f32.mrf.mxu0 }
 0x16f   : > { %747 = vst.msk [vmem:[#allocation2 + $0x8] sm:$0xff] %vm560_vm6, %v739_v36  ;;  %566 = vst.msk [vmem:[#allocation2 + $0x28] sm:$0xff] %vm560_vm6, %v548_v38  ;;  %v718_v44 = vpop.f32.mrf.mxu1 }
 0x170   : > { %v736_v39 = vld [vmem:[#allocation2 + $0x30] sm:$0xff] }
 0x171   : > { %v744_v40 = vadd.f32 %v1323_v31, %v736_v39  ;;  %v905_v49 = vld [vmem:[#allocation2 + $0x10] sm:$0xff]  ;;  %v1233_v31 = vunpack.c.h.bf16 %v1240_v11 }
 0x172   : > { %v734_v22 = vld [vmem:[#allocation2 + $0x20] sm:$0xff] }
 0x173   : > { %752 = vst.msk [vmem:[#allocation2 + $0x30] sm:$0xff] %vm560_vm6, %v744_v40  ;;  %v742_v32 = vadd.f32 %v734_v22, %v715_v37  ;;  %v903_v57 = vld [vmem:[#allocation2] sm:$0xff] }
 0x174   : > { %v737_v42 = vld [vmem:[#allocation2 + $0x38] sm:$0xff] }
 0x175   : > { %750 = vst.msk [vmem:[#allocation2 + $0x20] sm:$0xff] %vm560_vm6, %v742_v32  ;;  %v745_v43 = vadd.f32 %v1324_v41, %v737_v42  ;;  %v906_v61 = vld [vmem:[#allocation2 + $0x18] sm:$0xff] }
 0x176   : > { %v735_v45 = vld [vmem:[#allocation2 + $0x28] sm:$0xff] }
 0x177   : > { %753 = vst.msk [vmem:[#allocation2 + $0x38] sm:$0xff] %vm560_vm6, %v745_v43  ;;  %v743_v47 = vadd.f32 %v735_v45, %v718_v44  ;;  %v904_v3 = vld [vmem:[#allocation2 + $0x8] sm:$0xff] }
 0x179   : > { %751 = vst.msk [vmem:[#allocation2 + $0x28] sm:$0xff] %vm560_vm6, %v743_v47 }
 0x17a   : > { %v909_v53 = vld [vmem:[#allocation2 + $0x30] sm:$0xff] }
 0x17c   : > { %v907_v59 = vld [vmem:[#allocation2 + $0x20] sm:$0xff] }
 0x17e   : > { %v1343_v48 = vpop.f32.mrf.mxu0  ;;  %v910_v0 = vld [vmem:[#allocation2 + $0x38] sm:$0xff] }
 0x17f   : > { %v913_v50 = vadd.f32 %v1343_v48, %v905_v49  ;;  %v1347_v52 = vpop.f32.mrf.mxu1 }
 0x180   : > { %v917_v54 = vadd.f32 %v1347_v52, %v909_v53  ;;  %v872_v55 = vpop.f32.mrf.mxu0  ;;  %v908_v5 = vld [vmem:[#allocation2 + $0x28] sm:$0xff] }
 0x181   : > { %921 = vst.msk [vmem:[#allocation2 + $0x10] sm:$0xff] %vm560_vm6, %v913_v50  ;;  %v911_v46 = vadd.f32 %v903_v57, %v872_v55  ;;  %v888_v58 = vpop.f32.mrf.mxu1 }
 0x182   : > { %925 = vst.msk [vmem:[#allocation2 + $0x30] sm:$0xff] %vm560_vm6, %v917_v54  ;;  %v915_v60 = vadd.f32 %v907_v59, %v888_v58  ;;  %v1344_v56 = vpop.f32.mrf.mxu0 }
 0x183   : > { %919 = vst.msk [vmem:[#allocation2] sm:$0xff] %vm560_vm6, %v911_v46  ;;  %v914_v62 = vadd.f32 %v1344_v56, %v906_v61  ;;  %v1348_v63 = vpop.f32.mrf.mxu1 }
 0x184   : > { %923 = vst.msk [vmem:[#allocation2 + $0x20] sm:$0xff] %vm560_vm6, %v915_v60  ;;  %v918_v1 = vadd.f32 %v1348_v63, %v910_v0  ;;  %v875_v2 = vpop.f32.mrf.mxu0 }
 0x185   : > { %922 = vst.msk [vmem:[#allocation2 + $0x18] sm:$0xff] %vm560_vm6, %v914_v62  ;;  %v912_v51 = vadd.f32 %v904_v3, %v875_v2  ;;  %v891_v4 = vpop.f32.mrf.mxu1 }
 0x186   : > { %926 = vst.msk [vmem:[#allocation2 + $0x38] sm:$0xff] %vm560_vm6, %v918_v1  ;;  %v916_v8 = vadd.f32 %v908_v5, %v891_v4 }
 0x187   : > { %920 = vst.msk [vmem:[#allocation2 + $0x8] sm:$0xff] %vm560_vm6, %v912_v51 }
 0x188   : > { %v929_v12 = vld [vmem:[#allocation2 + $0x10] sm:$0xff]  ;;  %924 = vst.msk [vmem:[#allocation2 + $0x28] sm:$0xff] %vm560_vm6, %v916_v8 }
 0x189   : > { %v944_v16 = vadd.f32 %v1190_v7, %v929_v12  ;;  %v933_v17 = vld [vmem:[#allocation2 + $0x30] sm:$0xff] }
 0x18a   : > { %v948_v20 = vadd.f32 %v1190_v7, %v933_v17  ;;  %v927_v14 = vld [vmem:[#allocation2] sm:$0xff] }
 0x18b   : > { %v952_v23 = vmul.f32 0.2, %v944_v16  ;;  %v942_v24 = vadd.f32 %v1190_v7, %v927_v14  ;;  %v931_v25 = vld [vmem:[#allocation2 + $0x20] sm:$0xff] }
 0x18c   : > { %v956_v28 = vmul.f32 0.2, %v948_v20  ;;  %v946_v29 = vadd.f32 %v1190_v7, %v931_v25  ;;  %v930_v30 = vld [vmem:[#allocation2 + $0x18] sm:$0xff] }
 0x18d   : > { %v976_v33 = vadd.f32 %v1224_v13, %v952_v23  ;;  %v950_v34 = vmul.f32 0.2, %v942_v24  ;;  %v945_v35 = vadd.f32 %v1190_v7, %v930_v30  ;;  %v934_v36 = vld [vmem:[#allocation2 + $0x38] sm:$0xff] }
 0x18e   : > { %v980_v37 = vadd.f32 %v1232_v19, %v956_v28  ;;  %v954_v38 = vmul.f32 0.2, %v946_v29  ;;  %v949_v39 = vadd.f32 %v1190_v7, %v934_v36  ;;  %v928_v40 = vld [vmem:[#allocation2 + $0x8] sm:$0xff] }
 0x18f   : > { %v984_v22 = vpack.c.bf16 %v976_v33, %v976_v33  ;;  %v974_v41 = vadd.f32 %v1220_v18, %v950_v34  ;;  %v953_v32 = vmul.f32 0.2, %v945_v35  ;;  %v943_v42 = vadd.f32 %v1190_v7, %v928_v40  ;;  %v932_v43 = vld [vmem:[#allocation2 + $0x28] sm:$0xff] }
 0x190   : > { %v988_v44 = vpack.c.bf16 %v980_v37, %v980_v37  ;;  %v978_v45 = vadd.f32 %v1228_v26, %v954_v38  ;;  %v957_v47 = vmul.f32 0.2, %v949_v39  ;;  %v947_v48 = vadd.f32 %v1190_v7, %v932_v43 }
 0x191   : > { %v982_v49 = vpack.c.bf16 %v974_v41, %v974_v41  ;;  %v977_v50 = vadd.f32 %v1225_v21, %v953_v32  ;;  %v951_v52 = vmul.f32 0.2, %v943_v42  ;;  %993 = vst.msk [vmem:[%s240_s5 + $0x8] sm:$0xf] %vm990_vm7, %v984_v22 }
 0x192   : > { %v986_v53 = vpack.c.bf16 %v978_v45, %v978_v45  ;;  %v981_v54 = vadd.f32 %v1233_v31, %v957_v47  ;;  %v955_v55 = vmul.f32 0.2, %v947_v48  ;;  %997 = vst.msk [vmem:[%s240_s5 + $0x18] sm:$0xf] %vm990_vm7, %v988_v44 }
 0x193   : > { %v985_v57 = vpack.c.bf16 %v977_v50, %v977_v50  ;;  %v975_v46 = vadd.f32 %v1221_v15, %v951_v52  ;;  %991 = vst.msk [vmem:[%s240_s5] sm:$0xf] %vm990_vm7, %v982_v49 }
 0x194   : > { %v989_v58 = vpack.c.bf16 %v981_v54, %v981_v54  ;;  %v979_v59 = vadd.f32 %v1229_v27, %v955_v55  ;;  %995 = vst.msk [vmem:[%s240_s5 + $0x10] sm:$0xf] %vm990_vm7, %v986_v53 }
 0x195   : > { %v983_v60 = vpack.c.bf16 %v975_v46, %v975_v46  ;;  %994 = vst.msk [vmem:[%s240_s5 + $0xc] sm:$0xf] %vm990_vm7, %v985_v57 }
 0x196   : > { %v987_v56 = vpack.c.bf16 %v979_v59, %v979_v59  ;;  %998 = vst.msk [vmem:[%s240_s5 + $0x1c] sm:$0xf] %vm990_vm7, %v989_v58 }
 0x197   : > { %992 = vst.msk [vmem:[%s240_s5 + $0x4] sm:$0xf] %vm990_vm7, %v983_v60 }
 0x198   : > { %996 = vst.msk [vmem:[%s240_s5 + $0x14] sm:$0xf] %vm990_vm7, %v987_v56 }
 0x199   : > { %1496 = shalt.err (!%p1493_p5)
}
 0x19a   : > { %s1497_s14 = scalar_lea.hbm %s1903_s11, 512  ;;  %s1501_s26 = scalar_lea.hbm %s1961_s4, 1024 }
 0x19b   : > { %p1498_p6 = scmp.ne.s32.totalorder %s1903_s11, %s1497_s14  ;;  %p1502_p10 = scmp.lt.s32.totalorder %s1903_s11, %s1961_s4 }
 0x19c   : > { %p1503_p11 = scmp.lt.s32.totalorder %s1501_s26, %s1497_s14 }
 0x19d   : > { %p1499_p7 = pnand %p1498_p6, %p1631_p4 }
 0x19e   : > { %p1504_p12 = por %p1503_p11, %p1502_p10 }
 0x19f   : > { %p1500_p9 = pneg %p1499_p7 }
 0x1a1   : > { %p1505_p13 = pnand %p1504_p12, %p1500_p9 }
 0x1a3   : > { %1508 = shalt.err (!%p1505_p13)
}
 0x1a4   : > { %s1564_s5 = smov 64   ;;  %s1565_s6 = smov 4  }
 0x1a5   : > { %1370 = dma.vmem_to_hbm [thread:$0]  (%p1631_p4), %s1905_s8, 512, %s1903_s11, %s1912_s18, %s1564_s5, %s1564_s5, %s1565_s6  }
 0x1a6 PF: > { %p1376_p0 = scmp.ge.s32.totalorder %s1559_s20, 2  ;;  %s1030_s9 = sand.u32 1, %s1539_s15  }
 0x1a7   : > { %s1031_s10 = scalar_lea.sflag [#allocation4], %s1030_s9 }
 0x1a8   : > { %p1373_p1 = pnand %p1376_p0, %p1638_p8 }
 0x1aa   : > { %p1374_p2 = pneg %p1373_p1 }
 0x1ac   : > { %1534 = dma.done.wait (%p1374_p2), %s1031_s10, 512  }
 0x1ad   : > { %1536 = vsyncadd (%p1374_p2), %s1031_s10, 4294966784  ;;  %s17_s20 = sadd.s32 1, %s1559_s20   ;;  %s1964_s15 = smov %s1543_s16 }
 0x1ae   : > { %p14_p3 = scmp.ge.s32.totalorder %s17_s20, 4   ;;  %s1965_s16 = smov %s1547_s17 }
 0x1af   : > { %s1966_s17 = smov %s1644_s28  ;;  %s1967_s18 = smov %s1555_s19 }
 0x1b0   : > { %s1968_s19 = smov %s1970_s23  ;;  %16 = sbr.rel (!%p14_p3) target bundleno = 4 (0x4), region = 76 }
 0x1b5   :  { %1036 = vsyncpa [#allocation4], 1 }
 0x1b6   :  { %1038 = vsyncpa [#allocation4 + $0x1], 1 }

</bundles_post_ra>
